<compile_context>
chip_gen: v7x
topology: tpu7x:2x2x1
jax: 0.10.0
libtpu: 0.0.40
codegen_flags: <defaults>
</compile_context>

<pallas_src>
import functools
import math

import jax
import jax.numpy as jnp
from jax.experimental import pallas as pl
from jax.experimental.pallas import tpu as pltpu


def _round_up(x, m):
    return ((x + m - 1) // m) * m


def _vmem_capacity_bytes():
    try:
        return int(pltpu.get_tpu_info().vmem_capacity_bytes)
    except Exception:
        return 64 << 20  # conservative (v7x per-core VMEM)


def _conv1d_same_kernel(x_ref, w_ref, b_ref, o_ref, slab_ref, *,
                        K, dilation, off0, pad_off, L, L_slab,
                        TL, J, C_in, C_out, use_vpu):
    # x_ref:    (1, C_in, L)        raw (unpadded) trace, resident across j
    # w_ref:    (K*C_in, C_out, 1)  [VPU path]  or (C_out, K*C_in) [MXU path]
    # b_ref:    (C_out, 1)
    # o_ref:    (1, C_out, TL)      lane-dense output tile
    # slab_ref: (C_in, L_slab)      zero-padded copy of the trace (VMEM)
    j = pl.program_id(1)

    # Build the padded slab once per batch element: zero only the pad regions
    # and copy the trace at a 128-lane-aligned offset (unmasked stores).
    @pl.when(j == 0)
    def _fill_slab():
        if pad_off > 0:
            slab_ref[:, 0:pad_off] = jnp.zeros((C_in, pad_off), slab_ref.dtype)
        right = L_slab - (pad_off + L)
        if right > 0:
            slab_ref[:, pad_off + L:L_slab] = jnp.zeros((C_in, right),
                                                        slab_ref.dtype)
        slab_ref[:, pad_off:pad_off + L] = x_ref[0]

    if J == 1:
        base = off0                                   # static
    else:
        base = pl.multiple_of(j * TL, 128) + off0     # TL % 128 == 0 enforced

    bias = b_ref[...].astype(jnp.float32)             # (C_out, 1)

    if use_vpu:
        # Tiny channel counts: the MXU would run nearly empty, so accumulate
        # with scalar-broadcast FMAs on the VPU instead.
        acc = jnp.zeros((C_out, TL), jnp.float32)
        for k in range(K):
            for ci in range(C_in):
                row = slab_ref[ci:ci + 1, pl.ds(base + k * dilation, TL)]
                wk = w_ref[k * C_in + ci].astype(jnp.float32)   # (C_out, 1)
                acc = acc + wk * row.astype(jnp.float32)
    else:
        # One fused MXU contraction: stack the K shifted windows once, then
        # (C_out, K*C_in) @ (K*C_in, TL).
        parts = [slab_ref[:, pl.ds(base + k * dilation, TL)] for k in range(K)]
        rhs = jnp.concatenate(parts, axis=0)
        acc = jnp.dot(w_ref[...], rhs, preferred_element_type=jnp.float32)

    o_ref[0] = (acc + bias).astype(o_ref.dtype)


def conv1d_same(x, w, b, *, stride=1, dilation=1, l_tile=None):
    """Conv1dSame forward.  x: (N, C_in, L) NCL.  w: (C_out, C_in, K).  b: (C_out,)."""
    N, C_in, L = x.shape
    C_out, C_in_w, K = w.shape
    assert C_in_w == C_in

    cut_last = (K % 2 == 0) and (stride == 1) and (dilation % 2 == 1)
    padding = math.ceil((1 - stride + dilation * (K - 1)) / 2)
    conv_pad = padding + 1
    if conv_pad < 0:
        raise ValueError("negative padding not supported (matches nn.Conv1d)")
    L_conv = (L + 2 * conv_pad - dilation * (K - 1) - 1) // stride + 1
    L_final = L_conv - 1 if cut_last else L_conv

    # Kernel always computes the stride-1 conv over the padded trace; stride>1
    # is handled by subsampling the result in the wrapper (keeps every kernel
    # read contiguous and lane-dense).
    if stride == 1:
        L_kernel = L_final              # fold the [:, :, :-1] trim into the kernel
    else:
        L_kernel = (L_conv - 1) * stride + 1
    if L_kernel <= 0:
        raise ValueError("empty output")

    # Output-length tiling: generation-aware default, multiple of 128 when tiled.
    if l_tile is None:
        l_tile = 1024 if _vmem_capacity_bytes() >= (96 << 20) else 512
    l_tile = max(128, (int(l_tile) // 128) * 128)
    if L_kernel <= l_tile:
        TL, J = L_kernel, 1
    else:
        TL, J = l_tile, pl.cdiv(L_kernel, l_tile)

    # Slab layout: trace copied at a lane-aligned offset; residual offset off0
    # is folded into the per-tile read base.  Right pad is zeroed up to L_slab
    # so the last (possibly overhanging) tile reads only zeros past the trace.
    pad_off = _round_up(conv_pad, 128) if conv_pad > 0 else 0
    off0 = pad_off - conv_pad
    win = TL + (K - 1) * dilation
    L_slab = _round_up(max(off0 + (J - 1) * TL + win, pad_off + L), 128)

    use_vpu = (K * C_in <= 32) and (C_out <= 16)
    if use_vpu:
        # (K*C_in, C_out, 1): one broadcast-ready weight column per (tap, ci).
        w_k = jnp.transpose(w, (2, 1, 0)).reshape(K * C_in, C_out)[..., None]
        w_spec = pl.BlockSpec((K * C_in, C_out, 1), lambda n, j: (0, 0, 0))
    else:
        # (C_out, K*C_in): fused single-dot weights.
        w_k = jnp.transpose(w, (0, 2, 1)).reshape(C_out, K * C_in)
        w_spec = pl.BlockSpec((C_out, K * C_in), lambda n, j: (0, 0))
    b_col = b.reshape(C_out, 1)

    # Explicit VMEM budget (v7x has only 64 MiB physical / 32 MiB default scoped).
    dsize = x.dtype.itemsize
    est = dsize * (2 * C_in * L + C_in * L_slab + 2 * C_out * TL
                   + 2 * K * C_in * C_out + 2 * C_out) \
        + 4 * (C_out + K * C_in + C_in) * TL
    cap = _vmem_capacity_bytes()
    vmem_limit = int(min(max(2 * est + (8 << 20), 32 << 20),
                         max(cap - (16 << 20), 32 << 20)))

    kernel = functools.partial(
        _conv1d_same_kernel,
        K=K, dilation=dilation, off0=off0, pad_off=pad_off, L=L, L_slab=L_slab,
        TL=TL, J=J, C_in=C_in, C_out=C_out, use_vpu=use_vpu)

    out = pl.pallas_call(
        kernel,
        out_shape=jax.ShapeDtypeStruct((N, C_out, L_kernel), x.dtype),
        grid_spec=pltpu.PrefetchScalarGridSpec(
            num_scalar_prefetch=0,
            grid=(N, J),
            in_specs=[
                pl.BlockSpec((1, C_in, L), lambda n, j: (n, 0, 0)),  # resident across j
                w_spec,                                              # weights resident
                pl.BlockSpec((C_out, 1), lambda n, j: (0, 0)),       # bias resident
            ],
            out_specs=pl.BlockSpec((1, C_out, TL), lambda n, j: (n, 0, j)),
            scratch_shapes=[pltpu.VMEM((C_in, L_slab), x.dtype)],
        ),
        compiler_params=pltpu.CompilerParams(
            dimension_semantics=("parallel", "arbitrary"),
            vmem_limit_bytes=vmem_limit),
    )(x, w_k, b_col)

    if stride > 1:
        out = out[:, :, ::stride][:, :, :L_final]
    return out


def _reference(x, w, b, *, stride=1, dilation=1):
    """Pure-JAX replica of the PyTorch module (for correctness checks)."""
    C_out, C_in, K = w.shape
    cut_last = (K % 2 == 0) and (stride == 1) and (dilation % 2 == 1)
    padding = math.ceil((1 - stride + dilation * (K - 1)) / 2)
    conv_pad = padding + 1
    y = jax.lax.conv_general_dilated(
        x, w, window_strides=(stride,), padding=[(conv_pad, conv_pad)],
        rhs_dilation=(dilation,), dimension_numbers=("NCH", "OIH", "NCH"))
    y = y + b[None, :, None]
    return y[:, :, :-1] if cut_last else y


if __name__ == "__main__":
    def run_case(name, *, N, C_in, C_out, L, K, stride, dilation, l_tile, case):
        key = jax.random.fold_in(jax.random.PRNGKey(0), case)
        kx, kw, kb = jax.random.split(key, 3)
        x = jax.random.normal(kx, (N, C_in, L), dtype=jnp.float32)
        bound = 1.0 / math.sqrt(C_in * K)   # PyTorch Conv1d default init bounds
        w = jax.random.uniform(kw, (C_out, C_in, K), jnp.float32, -bound, bound)
        b = jax.random.uniform(kb, (C_out,), jnp.float32, -bound, bound)

        out = conv1d_same(x, w, b, stride=stride, dilation=dilation, l_tile=l_tile)
        out = jax.block_until_ready(out)
        ref = _reference(x, w, b, stride=stride, dilation=dilation)
        assert out.shape == ref.shape, (name, out.shape, ref.shape)
        err = float(jnp.max(jnp.abs(out - ref)))
        assert err < 2e-4, (name, err)

    # Conv1dSame(4, 8, kernel_size=4): even kernel -> cut_last branch (VPU path).
    run_case("base_even_k", N=2, C_in=4, C_out=8, L=16, K=4,
             stride=1, dilation=1, l_tile=None, case=0)
    # Long trace, tiled output (J>1, partial last tile), VPU path.
    run_case("tiled", N=1, C_in=4, C_out=8, L=400, K=5,
             stride=1, dilation=1, l_tile=128, case=1)
    # Dilated kernel.
    run_case("dilated", N=1, C_in=3, C_out=5, L=64, K=3,
             stride=1, dilation=2, l_tile=None, case=2)
    # Strided conv (wrapper subsampling path).
    run_case("strided", N=2, C_in=4, C_out=6, L=33, K=4,
             stride=2, dilation=1, l_tile=None, case=3)
    # Larger channel counts -> fused single-dot MXU path, tiled.
    run_case("mxu_fused", N=1, C_in=16, C_out=32, L=700, K=3,
             stride=1, dilation=1, l_tile=256, case=4)

    print("KERNEL_OK")
</pallas_src>

<mosaic_0001>
module attributes {stable_mosaic.version = 11 : i64} {
  func.func @_conv1d_same_kernel(%arg0: i32, %arg1: i32, %arg2: memref<1x4x16xf32, #tpu.memory_space<vmem>>, %arg3: memref<16x8x1xf32, #tpu.memory_space<vmem>>, %arg4: memref<8x1xf32, #tpu.memory_space<vmem>>, %arg5: memref<1x8x18xf32, #tpu.memory_space<vmem>>, %arg6: memref<4x256xf32, #tpu.memory_space<vmem>>) attributes {dimension_semantics = [#tpu.dimension_semantics<parallel>, #tpu.dimension_semantics<arbitrary>], iteration_bounds = array<i64: 2, 1>, scalar_prefetch = 0 : i64, scratch_operands = 1 : i64, tpu.core_type = #tpu.core_type<tc>, window_params = [{transform_indices = @transform_0, window_bounds = array<i64: 1, 4, 16>}, {pipeline_mode = #tpu.pipeline_mode<synchronous>, transform_indices = @transform_1, window_bounds = array<i64: 16, 8, 1>}, {pipeline_mode = #tpu.pipeline_mode<synchronous>, transform_indices = @transform_2, window_bounds = array<i64: 8, 1>}, {transform_indices = @transform_3, window_bounds = array<i64: 1, 8, 18>}]} {
    %c0_i32 = arith.constant 0 : i32
    %0 = arith.cmpi eq, %arg1, %c0_i32 : i32
    %1 = arith.extui %0 : i1 to i32
    %c0_i32_0 = arith.constant 0 : i32
    %2 = arith.cmpi ne, %1, %c0_i32_0 : i32
    scf.if %2 {
      %cst_66 = arith.constant 0.000000e+00 : f32
      %122 = vector.broadcast %cst_66 : f32 to vector<4x128xf32>
      %c0_67 = arith.constant 0 : index
      %c0_68 = arith.constant 0 : index
      %123 = vector.load %arg6[%c0_67, %c0_68] : memref<4x256xf32, #tpu.memory_space<vmem>>, vector<4x128xf32>
      tpu.vector_store %arg6[%c0_67, %c0_68], %122 {strides = array<i32>} : memref<4x256xf32, #tpu.memory_space<vmem>>, vector<4x128xf32>,
      %cst_69 = arith.constant 0.000000e+00 : f32
      %124 = vector.broadcast %cst_69 : f32 to vector<4x112xf32>
      %c0_70 = arith.constant 0 : index
      %c144 = arith.constant 144 : index
      %125 = vector.load %arg6[%c0_70, %c144] : memref<4x256xf32, #tpu.memory_space<vmem>>, vector<4x112xf32>
      tpu.vector_store %arg6[%c0_70, %c144], %124 {strides = array<i32>} : memref<4x256xf32, #tpu.memory_space<vmem>>, vector<4x112xf32>,
      %c0_71 = arith.constant 0 : index
      %c0_72 = arith.constant 0 : index
      %c0_73 = arith.constant 0 : index
      %126 = vector.load %arg2[%c0_71, %c0_72, %c0_73] : memref<1x4x16xf32, #tpu.memory_space<vmem>>, vector<1x4x16xf32>
      %127 = vector.shape_cast %126 : vector<1x4x16xf32> to vector<4x16xf32>
      %c0_74 = arith.constant 0 : index
      %c128_75 = arith.constant 128 : index
      %128 = vector.load %arg6[%c0_74, %c128_75] : memref<4x256xf32, #tpu.memory_space<vmem>>, vector<4x16xf32>
      tpu.vector_store %arg6[%c0_74, %c128_75], %127 {strides = array<i32>} : memref<4x256xf32, #tpu.memory_space<vmem>>, vector<4x16xf32>,
    } else {
    }
    %c0 = arith.constant 0 : index
    %c0_1 = arith.constant 0 : index
    %3 = vector.load %arg4[%c0, %c0_1] : memref<8x1xf32, #tpu.memory_space<vmem>>, vector<8x1xf32>
    %cst = arith.constant 0.000000e+00 : f32
    %4 = vector.broadcast %cst : f32 to vector<8x18xf32>
    %c0_2 = arith.constant 0 : index
    %c125 = arith.constant 125 : index
    %5 = vector.load %arg6[%c0_2, %c125] : memref<4x256xf32, #tpu.memory_space<vmem>>, vector<1x18xf32>
    %c0_3 = arith.constant 0 : index
    %c0_4 = arith.constant 0 : index
    %c0_5 = arith.constant 0 : index
    %6 = vector.load %arg3[%c0_3, %c0_4, %c0_5] : memref<16x8x1xf32, #tpu.memory_space<vmem>>, vector<1x8x1xf32>
    %7 = vector.shape_cast %6 : vector<1x8x1xf32> to vector<8x1xf32>
    %8 = vector.broadcast %7 : vector<8x1xf32> to vector<8x18xf32>
    %9 = vector.broadcast %5 : vector<1x18xf32> to vector<8x18xf32>
    %10 = arith.mulf %8, %9 : vector<8x18xf32>
    %11 = arith.addf %4, %10 : vector<8x18xf32>
    %c1 = arith.constant 1 : index
    %c125_6 = arith.constant 125 : index
    %12 = vector.load %arg6[%c1, %c125_6] : memref<4x256xf32, #tpu.memory_space<vmem>>, vector<1x18xf32>
    %c1_7 = arith.constant 1 : index
    %c0_8 = arith.constant 0 : index
    %c0_9 = arith.constant 0 : index
    %13 = vector.load %arg3[%c1_7, %c0_8, %c0_9] : memref<16x8x1xf32, #tpu.memory_space<vmem>>, vector<1x8x1xf32>
    %14 = vector.shape_cast %13 : vector<1x8x1xf32> to vector<8x1xf32>
    %15 = vector.broadcast %14 : vector<8x1xf32> to vector<8x18xf32>
    %16 = vector.broadcast %12 : vector<1x18xf32> to vector<8x18xf32>
    %17 = arith.mulf %15, %16 : vector<8x18xf32>
    %18 = arith.addf %11, %17 : vector<8x18xf32>
    %c2 = arith.constant 2 : index
    %c125_10 = arith.constant 125 : index
    %19 = vector.load %arg6[%c2, %c125_10] : memref<4x256xf32, #tpu.memory_space<vmem>>, vector<1x18xf32>
    %c2_11 = arith.constant 2 : index
    %c0_12 = arith.constant 0 : index
    %c0_13 = arith.constant 0 : index
    %20 = vector.load %arg3[%c2_11, %c0_12, %c0_13] : memref<16x8x1xf32, #tpu.memory_space<vmem>>, vector<1x8x1xf32>
    %21 = vector.shape_cast %20 : vector<1x8x1xf32> to vector<8x1xf32>
    %22 = vector.broadcast %21 : vector<8x1xf32> to vector<8x18xf32>
    %23 = vector.broadcast %19 : vector<1x18xf32> to vector<8x18xf32>
    %24 = arith.mulf %22, %23 : vector<8x18xf32>
    %25 = arith.addf %18, %24 : vector<8x18xf32>
    %c3 = arith.constant 3 : index
    %c125_14 = arith.constant 125 : index
    %26 = vector.load %arg6[%c3, %c125_14] : memref<4x256xf32, #tpu.memory_space<vmem>>, vector<1x18xf32>
    %c3_15 = arith.constant 3 : index
    %c0_16 = arith.constant 0 : index
    %c0_17 = arith.constant 0 : index
    %27 = vector.load %arg3[%c3_15, %c0_16, %c0_17] : memref<16x8x1xf32, #tpu.memory_space<vmem>>, vector<1x8x1xf32>
    %28 = vector.shape_cast %27 : vector<1x8x1xf32> to vector<8x1xf32>
    %29 = vector.broadcast %28 : vector<8x1xf32> to vector<8x18xf32>
    %30 = vector.broadcast %26 : vector<1x18xf32> to vector<8x18xf32>
    %31 = arith.mulf %29, %30 : vector<8x18xf32>
    %32 = arith.addf %25, %31 : vector<8x18xf32>
    %c0_18 = arith.constant 0 : index
    %c126 = arith.constant 126 : index
    %33 = vector.load %arg6[%c0_18, %c126] : memref<4x256xf32, #tpu.memory_space<vmem>>, vector<1x18xf32>
    %c4 = arith.constant 4 : index
    %c0_19 = arith.constant 0 : index
    %c0_20 = arith.constant 0 : index
    %34 = vector.load %arg3[%c4, %c0_19, %c0_20] : memref<16x8x1xf32, #tpu.memory_space<vmem>>, vector<1x8x1xf32>
    %35 = vector.shape_cast %34 : vector<1x8x1xf32> to vector<8x1xf32>
    %36 = vector.broadcast %35 : vector<8x1xf32> to vector<8x18xf32>
    %37 = vector.broadcast %33 : vector<1x18xf32> to vector<8x18xf32>
    %38 = arith.mulf %36, %37 : vector<8x18xf32>
    %39 = arith.addf %32, %38 : vector<8x18xf32>
    %c1_21 = arith.constant 1 : index
    %c126_22 = arith.constant 126 : index
    %40 = vector.load %arg6[%c1_21, %c126_22] : memref<4x256xf32, #tpu.memory_space<vmem>>, vector<1x18xf32>
    %c5 = arith.constant 5 : index
    %c0_23 = arith.constant 0 : index
    %c0_24 = arith.constant 0 : index
    %41 = vector.load %arg3[%c5, %c0_23, %c0_24] : memref<16x8x1xf32, #tpu.memory_space<vmem>>, vector<1x8x1xf32>
    %42 = vector.shape_cast %41 : vector<1x8x1xf32> to vector<8x1xf32>
    %43 = vector.broadcast %42 : vector<8x1xf32> to vector<8x18xf32>
    %44 = vector.broadcast %40 : vector<1x18xf32> to vector<8x18xf32>
    %45 = arith.mulf %43, %44 : vector<8x18xf32>
    %46 = arith.addf %39, %45 : vector<8x18xf32>
    %c2_25 = arith.constant 2 : index
    %c126_26 = arith.constant 126 : index
    %47 = vector.load %arg6[%c2_25, %c126_26] : memref<4x256xf32, #tpu.memory_space<vmem>>, vector<1x18xf32>
    %c6 = arith.constant 6 : index
    %c0_27 = arith.constant 0 : index
    %c0_28 = arith.constant 0 : index
    %48 = vector.load %arg3[%c6, %c0_27, %c0_28] : memref<16x8x1xf32, #tpu.memory_space<vmem>>, vector<1x8x1xf32>
    %49 = vector.shape_cast %48 : vector<1x8x1xf32> to vector<8x1xf32>
    %50 = vector.broadcast %49 : vector<8x1xf32> to vector<8x18xf32>
    %51 = vector.broadcast %47 : vector<1x18xf32> to vector<8x18xf32>
    %52 = arith.mulf %50, %51 : vector<8x18xf32>
    %53 = arith.addf %46, %52 : vector<8x18xf32>
    %c3_29 = arith.constant 3 : index
    %c126_30 = arith.constant 126 : index
    %54 = vector.load %arg6[%c3_29, %c126_30] : memref<4x256xf32, #tpu.memory_space<vmem>>, vector<1x18xf32>
    %c7 = arith.constant 7 : index
    %c0_31 = arith.constant 0 : index
    %c0_32 = arith.constant 0 : index
    %55 = vector.load %arg3[%c7, %c0_31, %c0_32] : memref<16x8x1xf32, #tpu.memory_space<vmem>>, vector<1x8x1xf32>
    %56 = vector.shape_cast %55 : vector<1x8x1xf32> to vector<8x1xf32>
    %57 = vector.broadcast %56 : vector<8x1xf32> to vector<8x18xf32>
    %58 = vector.broadcast %54 : vector<1x18xf32> to vector<8x18xf32>
    %59 = arith.mulf %57, %58 : vector<8x18xf32>
    %60 = arith.addf %53, %59 : vector<8x18xf32>
    %c0_33 = arith.constant 0 : index
    %c127 = arith.constant 127 : index
    %61 = vector.load %arg6[%c0_33, %c127] : memref<4x256xf32, #tpu.memory_space<vmem>>, vector<1x18xf32>
    %c8 = arith.constant 8 : index
    %c0_34 = arith.constant 0 : index
    %c0_35 = arith.constant 0 : index
    %62 = vector.load %arg3[%c8, %c0_34, %c0_35] : memref<16x8x1xf32, #tpu.memory_space<vmem>>, vector<1x8x1xf32>
    %63 = vector.shape_cast %62 : vector<1x8x1xf32> to vector<8x1xf32>
    %64 = vector.broadcast %63 : vector<8x1xf32> to vector<8x18xf32>
    %65 = vector.broadcast %61 : vector<1x18xf32> to vector<8x18xf32>
    %66 = arith.mulf %64, %65 : vector<8x18xf32>
    %67 = arith.addf %60, %66 : vector<8x18xf32>
    %c1_36 = arith.constant 1 : index
    %c127_37 = arith.constant 127 : index
    %68 = vector.load %arg6[%c1_36, %c127_37] : memref<4x256xf32, #tpu.memory_space<vmem>>, vector<1x18xf32>
    %c9 = arith.constant 9 : index
    %c0_38 = arith.constant 0 : index
    %c0_39 = arith.constant 0 : index
    %69 = vector.load %arg3[%c9, %c0_38, %c0_39] : memref<16x8x1xf32, #tpu.memory_space<vmem>>, vector<1x8x1xf32>
    %70 = vector.shape_cast %69 : vector<1x8x1xf32> to vector<8x1xf32>
    %71 = vector.broadcast %70 : vector<8x1xf32> to vector<8x18xf32>
    %72 = vector.broadcast %68 : vector<1x18xf32> to vector<8x18xf32>
    %73 = arith.mulf %71, %72 : vector<8x18xf32>
    %74 = arith.addf %67, %73 : vector<8x18xf32>
    %c2_40 = arith.constant 2 : index
    %c127_41 = arith.constant 127 : index
    %75 = vector.load %arg6[%c2_40, %c127_41] : memref<4x256xf32, #tpu.memory_space<vmem>>, vector<1x18xf32>
    %c10 = arith.constant 10 : index
    %c0_42 = arith.constant 0 : index
    %c0_43 = arith.constant 0 : index
    %76 = vector.load %arg3[%c10, %c0_42, %c0_43] : memref<16x8x1xf32, #tpu.memory_space<vmem>>, vector<1x8x1xf32>
    %77 = vector.shape_cast %76 : vector<1x8x1xf32> to vector<8x1xf32>
    %78 = vector.broadcast %77 : vector<8x1xf32> to vector<8x18xf32>
    %79 = vector.broadcast %75 : vector<1x18xf32> to vector<8x18xf32>
    %80 = arith.mulf %78, %79 : vector<8x18xf32>
    %81 = arith.addf %74, %80 : vector<8x18xf32>
    %c3_44 = arith.constant 3 : index
    %c127_45 = arith.constant 127 : index
    %82 = vector.load %arg6[%c3_44, %c127_45] : memref<4x256xf32, #tpu.memory_space<vmem>>, vector<1x18xf32>
    %c11 = arith.constant 11 : index
    %c0_46 = arith.constant 0 : index
    %c0_47 = arith.constant 0 : index
    %83 = vector.load %arg3[%c11, %c0_46, %c0_47] : memref<16x8x1xf32, #tpu.memory_space<vmem>>, vector<1x8x1xf32>
    %84 = vector.shape_cast %83 : vector<1x8x1xf32> to vector<8x1xf32>
    %85 = vector.broadcast %84 : vector<8x1xf32> to vector<8x18xf32>
    %86 = vector.broadcast %82 : vector<1x18xf32> to vector<8x18xf32>
    %87 = arith.mulf %85, %86 : vector<8x18xf32>
    %88 = arith.addf %81, %87 : vector<8x18xf32>
    %c0_48 = arith.constant 0 : index
    %c128 = arith.constant 128 : index
    %89 = vector.load %arg6[%c0_48, %c128] : memref<4x256xf32, #tpu.memory_space<vmem>>, vector<1x18xf32>
    %c12 = arith.constant 12 : index
    %c0_49 = arith.constant 0 : index
    %c0_50 = arith.constant 0 : index
    %90 = vector.load %arg3[%c12, %c0_49, %c0_50] : memref<16x8x1xf32, #tpu.memory_space<vmem>>, vector<1x8x1xf32>
    %91 = vector.shape_cast %90 : vector<1x8x1xf32> to vector<8x1xf32>
    %92 = vector.broadcast %91 : vector<8x1xf32> to vector<8x18xf32>
    %93 = vector.broadcast %89 : vector<1x18xf32> to vector<8x18xf32>
    %94 = arith.mulf %92, %93 : vector<8x18xf32>
    %95 = arith.addf %88, %94 : vector<8x18xf32>
    %c1_51 = arith.constant 1 : index
    %c128_52 = arith.constant 128 : index
    %96 = vector.load %arg6[%c1_51, %c128_52] : memref<4x256xf32, #tpu.memory_space<vmem>>, vector<1x18xf32>
    %c13 = arith.constant 13 : index
    %c0_53 = arith.constant 0 : index
    %c0_54 = arith.constant 0 : index
    %97 = vector.load %arg3[%c13, %c0_53, %c0_54] : memref<16x8x1xf32, #tpu.memory_space<vmem>>, vector<1x8x1xf32>
    %98 = vector.shape_cast %97 : vector<1x8x1xf32> to vector<8x1xf32>
    %99 = vector.broadcast %98 : vector<8x1xf32> to vector<8x18xf32>
    %100 = vector.broadcast %96 : vector<1x18xf32> to vector<8x18xf32>
    %101 = arith.mulf %99, %100 : vector<8x18xf32>
    %102 = arith.addf %95, %101 : vector<8x18xf32>
    %c2_55 = arith.constant 2 : index
    %c128_56 = arith.constant 128 : index
    %103 = vector.load %arg6[%c2_55, %c128_56] : memref<4x256xf32, #tpu.memory_space<vmem>>, vector<1x18xf32>
    %c14 = arith.constant 14 : index
    %c0_57 = arith.constant 0 : index
    %c0_58 = arith.constant 0 : index
    %104 = vector.load %arg3[%c14, %c0_57, %c0_58] : memref<16x8x1xf32, #tpu.memory_space<vmem>>, vector<1x8x1xf32>
    %105 = vector.shape_cast %104 : vector<1x8x1xf32> to vector<8x1xf32>
    %106 = vector.broadcast %105 : vector<8x1xf32> to vector<8x18xf32>
    %107 = vector.broadcast %103 : vector<1x18xf32> to vector<8x18xf32>
    %108 = arith.mulf %106, %107 : vector<8x18xf32>
    %109 = arith.addf %102, %108 : vector<8x18xf32>
    %c3_59 = arith.constant 3 : index
    %c128_60 = arith.constant 128 : index
    %110 = vector.load %arg6[%c3_59, %c128_60] : memref<4x256xf32, #tpu.memory_space<vmem>>, vector<1x18xf32>
    %c15 = arith.constant 15 : index
    %c0_61 = arith.constant 0 : index
    %c0_62 = arith.constant 0 : index
    %111 = vector.load %arg3[%c15, %c0_61, %c0_62] : memref<16x8x1xf32, #tpu.memory_space<vmem>>, vector<1x8x1xf32>
    %112 = vector.shape_cast %111 : vector<1x8x1xf32> to vector<8x1xf32>
    %113 = vector.broadcast %112 : vector<8x1xf32> to vector<8x18xf32>
    %114 = vector.broadcast %110 : vector<1x18xf32> to vector<8x18xf32>
    %115 = arith.mulf %113, %114 : vector<8x18xf32>
    %116 = arith.addf %109, %115 : vector<8x18xf32>
    %117 = vector.broadcast %3 : vector<8x1xf32> to vector<8x18xf32>
    %118 = arith.addf %116, %117 : vector<8x18xf32>
    %c0_63 = arith.constant 0 : index
    %c0_64 = arith.constant 0 : index
    %c0_65 = arith.constant 0 : index
    %119 = vector.load %arg5[%c0_63, %c0_64, %c0_65] : memref<1x8x18xf32, #tpu.memory_space<vmem>>, vector<1x8x18xf32>
    %120 = vector.shape_cast %119 : vector<1x8x18xf32> to vector<8x18xf32>
    %121 = vector.shape_cast %118 : vector<8x18xf32> to vector<1x8x18xf32>
    tpu.vector_store %arg5[%c0_63, %c0_64, %c0_65], %121 {strides = array<i32>} : memref<1x8x18xf32, #tpu.memory_space<vmem>>, vector<1x8x18xf32>,
    return
  }
  func.func @transform_0(%arg0: i32, %arg1: i32) -> (i32, i32, i32) {
    %c0_i32 = arith.constant 0 : i32
    %c0_i32_0 = arith.constant 0 : i32
    %c0_i32_1 = arith.constant 0 : i32
    return %arg0, %c0_i32, %c0_i32_0 : i32, i32, i32
  }
  func.func @transform_1(%arg0: i32, %arg1: i32) -> (i32, i32, i32) {
    %c0_i32 = arith.constant 0 : i32
    %c0_i32_0 = arith.constant 0 : i32
    %c0_i32_1 = arith.constant 0 : i32
    %c0_i32_2 = arith.constant 0 : i32
    return %c0_i32, %c0_i32_0, %c0_i32_1 : i32, i32, i32
  }
  func.func @transform_2(%arg0: i32, %arg1: i32) -> (i32, i32) {
    %c0_i32 = arith.constant 0 : i32
    %c0_i32_0 = arith.constant 0 : i32
    %c0_i32_1 = arith.constant 0 : i32
    return %c0_i32, %c0_i32_0 : i32, i32
  }
  func.func @transform_3(%arg0: i32, %arg1: i32) -> (i32, i32, i32) {
    %c0_i32 = arith.constant 0 : i32
    %c0_i32_0 = arith.constant 0 : i32
    return %arg0, %c0_i32, %arg1 : i32, i32, i32
  }
}

</mosaic_0001>

<bundles_post_ra>
// kernel: tpu_custom_call.1
= control target key start
LH: loop header
LB: loop body
LE: loop exit
PB: predicated region body
PF: predicated region fallthrough
CT: control target
= control target key end

     0   :  { %8 = vsyncpa [#allocation4], 0  ;;  %s1028_s0 = inlined_call_operand.vmem [shape: f32[2,4,16], index: 0, kind: input, shape index: {}]   ;;  %s1029_s1 = inlined_call_operand.vmem [shape: f32[16,8,1], index: 1, kind: input, shape index: {}]   ;;  %s1030_s2 = inlined_call_operand.vmem [shape: f32[8,1], index: 2, kind: input, shape index: {}]   ;;  %s1031_s3 = inlined_call_operand.hbm [shape: f32[2,8,18], index: 3, kind: output, shape index: {}]  }
   0x1   :  { %10 = vsyncpa [#allocation4 + $0x1], 0  ;;  %s853_s12 = smov 0   ;;  %s855_s13 = smov 0  }
   0x2   :  { %s857_s14 = smov 0   ;;  %s859_s15 = smov 0  }
   0x3   :  { %s861_s16 = smov 0   ;;  %s863_s17 = smov 0  }
   0x4 LB: > { %s653_s18 = sadd.s32 4294967295, %s824_s17   ;;  %s654_s19 = sadd.s32 4294967294, %s824_s17   ;;  %s824_s17 = sphi %s863_s17, %s16_s17   ;;  %s820_s16 = sphi %s861_s16, %s1038_s16   ;;  %s816_s15 = sphi %s859_s15, %s1037_s15   ;;  %s812_s14 = sphi %s857_s14, %s1036_s14   ;;  %s808_s13 = sphi %s855_s13, %s1035_s13   ;;  %s804_s12 = sphi %s853_s12, %s1034_s12  }
   0x5   : > { %s28_s20 = sadd.s32 1, %s820_s16  ;;  %s105_s21 = sadd.s32 1, %s812_s14 }
   0x6   : > { %p30_p0 = scmp.ge.s32.totalorder %s28_s20, 2  ;;  %p115_p1 = scmp.ne.s32.totalorder %s812_s14, %s808_s13 }
   0x7   : > { %p116_p2 = scmp.eq.s32.totalorder %s653_s18, 1  ;;  %p121_p3 = scmp.ne.s32.totalorder %s808_s13, %s804_s12 }
   0x8   : > { %s1040_s20 = smov (%p30_p0, %s28_s20), 0  ;;  %p122_p5 = scmp.eq.s32.totalorder %s654_s19, 1 }
   0x9   : > { %p893_p4 = por %p116_p2, %p115_p1  ;;  %s100_s23 = ssub.s32 %s820_s16, %s1040_s20 }
   0xa   : > { %p657_p6 = scmp.ge.s32.totalorder %s824_s17, 1  ;;  %p103_p7 = scmp.eq.s32.totalorder %s100_s23, 0 }
   0xb   : > { %p900_p8 = por %p122_p5, %p121_p3  ;;  %p153_p9 = scmp.lt.s32.totalorder %s824_s17, 3 }
   0xc   : > { %s906_s25 = scalar_select %p103_p7, %s812_s14, %s105_s21  }
   0xd   : > { %p154_p10 = pnand %p657_p6, %p153_p9 }
   0xe   : > { %v665_v0 = vld [vmem:[%s1029_s1 + $0x30] sm:$0xff] (!%p154_p10)  ;;  %v663_v1 = vld [vmem:[%s1029_s1 + $0x20] sm:$0xff] (!%p154_p10)  ;;  %p176_p11 = scmp.lt.s32.totalorder (!%p154_p10), %s816_s15, 1  ;;  %v826_v2 = vmov (!%p154_p10), 0   ;;  %v827_v3 = vmov (!%p154_p10), 0.0   ;;  %vm185_vm0 = vcmask (!%p154_p10), 1043584   ;;  %v199_v19 = vlaneseq (!%p154_p10) }
   0xf   : > { %157 = sbr.rel (%p154_p10) target bundleno = 446 (0x1be), region = 32  ;;  %745 = vset.pattern.permute.xlu1 (!%p154_p10), %v826_v2  ;;  %744 = vset.pattern.permute.xlu0 (!%p154_p10), %v826_v2  ;;  %184 = vst [vmem:[#allocation2] sm:$0xf] (!%p154_p10), %v827_v3  ;;  %186 = vst.msk [vmem:[#allocation2 + $0x4] sm:$0xf] (!%p154_p10), %vm185_vm0, %v827_v3  ;;  %v666_v4 = vld [vmem:[%s1029_s1 + $0x38] sm:$0xff] (!%p154_p10) }
  0x10   : > { %359 = vperm.xlu1 (!%p154_p10), %745, %v665_v0   ;;  %318 = vperm.xlu0 (!%p154_p10), %744, %v663_v1   ;;  %v664_v5 = vld [vmem:[%s1029_s1 + $0x28] sm:$0xff] (!%p154_p10)  ;;  %vm188_vm1 = vcmask (!%p154_p10), 125952   ;;  %v667_v8 = vld [vmem:[%s1029_s1 + $0x40] sm:$0xff] (!%p154_p10)  ;;  %v670_v9 = vld [vmem:[%s1029_s1 + $0x58] sm:$0xff] (!%p154_p10)  ;;  %v200_v20 = vshrl.u32 (!%p154_p10), %v199_v19, 7  ;;  %s828_s29 = smov (!%p154_p10), 127  }
  0x11   : > { %v668_v7 = vld [vmem:[%s1029_s1 + $0x48] sm:$0xff] (!%p154_p10)  ;;  %v669_v10 = vld [vmem:[%s1029_s1 + $0x50] sm:$0xff] (!%p154_p10)  ;;  %v671_v12 = vld [vmem:[%s1029_s1 + $0x60] sm:$0xff] (!%p154_p10)  ;;  %s830_s6 = smov (!%p154_p10), 125   ;;  %vm329_vm2 = vcmask (!%p154_p10), 1039360   ;;  %vm410_vm3 = vcmask (!%p154_p10), 1031168  }
  0x12   : > { %v673_v11 = vld [vmem:[%s1029_s1 + $0x68] sm:$0xff] (!%p154_p10)  ;;  %v677_v13 = vld [vmem:[%s1029_s1 + $0x78] sm:$0xff] (!%p154_p10)  ;;  %v675_v14 = vld [vmem:[%s1029_s1 + $0x70] sm:$0xff] (!%p154_p10)  ;;  %v201_v21 = vsub.s32 (!%p154_p10), 0, %v200_v20  ;;  %v205_v22 = vsub.s32 (!%p154_p10), 4, %v200_v20  ;;  %s831_s7 = smov (!%p154_p10), 3  }
  0x13   : > { %v660_v15 = vld [vmem:[%s1029_s1 + $0x8] sm:$0xff] (!%p154_p10)  ;;  %v192_v16 = vld [vmem:[%s1029_s1] sm:$0xff] (!%p154_p10)  ;;  %v662_v17 = vld [vmem:[%s1029_s1 + $0x18] sm:$0xff] (!%p154_p10)  ;;  %s680_s10 = sshll.u32 (!%p154_p10), %s816_s15, 7  ;;  %vm565_vm4 = vcmask (!%p154_p10), 23552   ;;  %vm568_vm5 = vcmask (!%p154_p10), 146432  }
  0x14   : > { %379 = vperm.xlu1 (!%p154_p10), %745, %v666_v4   ;;  %339 = vperm.xlu0 (!%p154_p10), %744, %v664_v5   ;;  %v661_v18 = vld [vmem:[%s1029_s1 + $0x10] sm:$0xff] (!%p154_p10)  ;;  %s981_s23 = scalar_lea.hbm (!%p154_p10), %s1031_s3, %s680_s10  ;;  %s832_s27 = smov (!%p154_p10), [#allocation3]  }
  0x15   : > { %s750_s28 = sshll.u32 (!%p154_p10), %s832_s27, 4  ;;  %s751_s28 = int_to_ptr.vmem [resolvable:$false] %s750_s28 }
  0x16   : > { %s177_s30 = scalar_select %p176_p11, %s816_s15, 1 }
  0x18   : > { %s659_s8 = sshll.u32 %s177_s30, 2  ;;  %420 = vperm.xlu1 %745, %v668_v7   ;;  %399 = vperm.xlu0 %744, %v667_v8   ;;  %s829_s30 = smov 126  }
  0x19   : > { %s179_s11 = scalar_lea.vmem %s1028_s0, %s659_s8  ;;  %s173_s8 = sand.u32 1, %s808_s13  }
  0x1a   : > { %v187_v6 = vld [vmem:[%s179_s11] sm:$0xf]  ;;  %s658_s9 = sshll.u32 %s173_s8, 3  ;;  %s571_s26 = scalar_lea.sflag [#allocation4], %s173_s8 }
  0x1b   : > { %189 = vst.msk [vmem:[#allocation2 + $0x4] sm:$0xf] %vm188_vm1, %v187_v6  ;;  %s175_s11 = scalar_lea.vmem [#allocation3], %s658_s9 }
  0x1c   : > { %460 = vperm.xlu1 %745, %v670_v9   ;;  %440 = vperm.xlu0 %744, %v669_v10   ;;  %s585_s18 = sshll.u32 %s175_s11, 4  ;;  %s983_s18 = int_to_ptr.vmem [resolvable:$true] %s585_s18 }
  0x1d   : > { %s746_s15 = scalar_lea.vmem %s983_s18, 128  ;;  %p753_p1 = scmp.lt.s32.totalorder %s983_s18, %s751_s28 }
  0x1e   : > { %p747_p12 = scmp.ne.s32.totalorder %s983_s18, %s746_s15 }
  0x20   : > { %500 = vperm.xlu1 %745, %v673_v11   ;;  %481 = vperm.xlu0 %744, %v671_v12   ;;  %p748_p13 = pnand %p747_p12, %p893_p4 }
  0x22   : > { %v191_v23 = vld [vmem:[#allocation2] sm:$0x11]  ;;  %v221_v26 = vld [vmem:[#allocation2 + $0x1] sm:$0x11]  ;;  %v252_v27 = vld [vmem:[#allocation2 + $0x2] sm:$0x11]  ;;  %p749_p0 = pneg %p748_p13 }
  0x23   : > { %v202_v24 = vrot.slane %v191_v23, %v201_v21  ;;  %v206_v25 = vrot.slane %v191_v23, %v205_v22  ;;  %v233_v30 = vrot.slane %v221_v26, %v201_v21  ;;  %v237_v31 = vrot.slane %v221_v26, %v205_v22  ;;  %v283_v40 = vld [vmem:[#allocation2 + $0x3] sm:$0x11]  ;;  %v672_v19 = vld [vmem:[#allocation2 + $0x4] ss:$0 sm:$0xff] }
  0x24   : > { %538 = vperm.xlu1 %745, %v677_v13   ;;  %519 = vperm.xlu0 %744, %v675_v14   ;;  %v264_v32 = vrot.slane %v252_v27, %v201_v21  ;;  %v268_v33 = vrot.slane %v252_v27, %v205_v22  ;;  %v295_v45 = vrot.slane %v283_v40, %v201_v21 }
  0x25   : > { %v212_v28 = vrot.slane %v202_v24, %v201_v21  ;;  %v216_v29 = vrot.slane %v206_v25, %v201_v21  ;;  %v243_v38 = vrot.slane %v233_v30, %v201_v21  ;;  %v247_v39 = vrot.slane %v237_v31, %v201_v21  ;;  %v190_v24 = vld [vmem:[%s1030_s2] sm:$0xff] }
  0x26   : > { %v274_v41 = vrot.slane %v264_v32, %v201_v21  ;;  %v278_v42 = vrot.slane %v268_v33, %v201_v21  ;;  %v299_v46 = vrot.slane %v283_v40, %v205_v22  ;;  %v305_v53 = vrot.slane %v295_v45, %v201_v21  ;;  %v678_v32 = vld [vmem:[#allocation2 + $0x7] ss:$0 sm:$0xff] }
  0x28   : > { %226 = vperm.xlu1 %745, %v660_v15   ;;  %195 = vperm.xlu0 %744, %v192_v16   ;;  %v309_v54 = vrot.slane %v299_v46, %v201_v21 }
  0x2c   : > { %288 = vperm.xlu1 %745, %v662_v17   ;;  %257 = vperm.xlu0 %744, %v661_v18  }
  0x8f   : > { %v360_v34 = vpop.permute.xlu1 %359  ;;  %v319_v35 = vpop.permute.xlu0 %318 }
  0x90   : > { %v321_v36 = vmul.f32 %v319_v35, %v212_v28  ;;  %v322_v37 = vmul.f32 %v319_v35, %v216_v29  ;;  %v362_v49 = vmul.f32 %v360_v34, %v274_v41  ;;  %v363_v50 = vmul.f32 %v360_v34, %v278_v42 }
  0x92   : > { %327 = vrot.lane.b32.xlu1 %v322_v37, %s828_s29  ;;  %325 = vrot.lane.b32.xlu0 %v321_v36, %s828_s29 }
  0x93   : > { %v380_v43 = vpop.permute.xlu1 %379  ;;  %v340_v44 = vpop.permute.xlu0 %339 }
  0x94   : > { %v342_v47 = vmul.f32 %v340_v44, %v243_v38  ;;  %v343_v48 = vmul.f32 %v340_v44, %v247_v39  ;;  %v382_v57 = vmul.f32 %v380_v43, %v305_v53  ;;  %v383_v58 = vmul.f32 %v380_v43, %v309_v54 }
  0x96   : > { %348 = vrot.lane.b32.xlu1 %v343_v48, %s828_s29  ;;  %346 = vrot.lane.b32.xlu0 %v342_v47, %s828_s29 }
  0x97   : > { %v421_v51 = vpop.permute.xlu1 %420  ;;  %v400_v52 = vpop.permute.xlu0 %399 }
  0x98   : > { %v402_v61 = vmul.f32 %v400_v52, %v212_v28  ;;  %v403_v62 = vmul.f32 %v400_v52, %v216_v29  ;;  %v423_v1 = vmul.f32 %v421_v51, %v243_v38  ;;  %v424_v2 = vmul.f32 %v421_v51, %v247_v39 }
  0x9a   : > { %368 = vrot.lane.b32.xlu1 %v363_v50, %s828_s29  ;;  %366 = vrot.lane.b32.xlu0 %v362_v49, %s828_s29 }
  0x9b   : > { %v461_v55 = vpop.permute.xlu1 %460  ;;  %v441_v56 = vpop.permute.xlu0 %440 }
  0x9c   : > { %v443_v3 = vmul.f32 %v441_v56, %v274_v41  ;;  %v444_v4 = vmul.f32 %v441_v56, %v278_v42  ;;  %v463_v15 = vmul.f32 %v461_v55, %v305_v53  ;;  %v464_v16 = vmul.f32 %v461_v55, %v309_v54 }
  0x9e   : > { %388 = vrot.lane.b32.xlu1 %v383_v58, %s828_s29  ;;  %386 = vrot.lane.b32.xlu0 %v382_v57, %s828_s29  ;;  %s752_s29 = scalar_lea.vmem %s751_s28, 256 }
  0x9f   : > { %v501_v59 = vpop.permute.xlu1 %500  ;;  %v482_v60 = vpop.permute.xlu0 %481  ;;  %p754_p2 = scmp.lt.s32.totalorder %s752_s29, %s746_s15 }
  0xa0   : > { %v488_v25 = vmul.f32 %v672_v19, %v482_v60 }
  0xa1   : > { %p755_p3 = por %p754_p2, %p753_p1 }
  0xa2   : > { %408 = vrot.lane.b32.xlu1 %v403_v62, %s829_s30  ;;  %406 = vrot.lane.b32.xlu0 %v402_v61, %s829_s30 }
  0xa3   : > { %v539_v63 = vpop.permute.xlu1 %538  ;;  %v520_v0 = vpop.permute.xlu0 %519  ;;  %p756_p5 = pnand %p755_p3, %p749_p0 }
  0xa4   : > { %v545_v33 = vmul.f32 %v678_v32, %v539_v63 }
  0xa6   : > { %429 = vrot.lane.b32.xlu1 %v424_v2, %s829_s30  ;;  %427 = vrot.lane.b32.xlu0 %v423_v1, %s829_s30 }
  0xa7   : > { %v227_v5 = vpop.permute.xlu1 %226  ;;  %v196_v6 = vpop.permute.xlu0 %195 }
  0xa8   : > { %v248_v7 = vmul.f32 %v243_v38, %v227_v5  ;;  %v249_v8 = vmul.f32 %v247_v39, %v227_v5  ;;  %v217_v9 = vmul.f32 %v212_v28, %v196_v6  ;;  %v218_v10 = vmul.f32 %v216_v29, %v196_v6  ;;  %v674_v28 = vld [vmem:[#allocation2 + $0x5] ss:$0 sm:$0xff]  ;;  %v676_v29 = vld [vmem:[#allocation2 + $0x6] ss:$0 sm:$0xff] }
  0xa9   : > { %v507_v30 = vmul.f32 %v674_v28, %v501_v59  ;;  %v526_v31 = vmul.f32 %v676_v29, %v520_v0 }
  0xaa   : > { %v250_v11 = vadd.f32 %v248_v7, %v217_v9  ;;  %v251_v12 = vadd.f32 %v249_v8, %v218_v10  ;;  %449 = vrot.lane.b32.xlu1 %v444_v4, %s829_s30  ;;  %447 = vrot.lane.b32.xlu0 %v443_v3, %s829_s30 }
  0xab   : > { %v289_v13 = vpop.permute.xlu1 %288  ;;  %v258_v14 = vpop.permute.xlu0 %257 }
  0xac   : > { %v279_v17 = vmul.f32 %v274_v41, %v258_v14  ;;  %v280_v18 = vmul.f32 %v278_v42, %v258_v14  ;;  %v310_v20 = vmul.f32 %v305_v53, %v289_v13  ;;  %v311_v21 = vmul.f32 %v309_v54, %v289_v13 }
  0xae   : > { %v281_v22 = vadd.f32 %v279_v17, %v250_v11  ;;  %v282_v23 = vadd.f32 %v280_v18, %v251_v12  ;;  %469 = vrot.lane.b32.xlu1 %v464_v16, %s829_s30  ;;  %467 = vrot.lane.b32.xlu0 %v463_v15, %s829_s30 }
  0xb0   : > { %v313_v26 = vadd.f32 %v311_v21, %v282_v23  ;;  %v312_v27 = vadd.f32 %v310_v20, %v281_v22 }
  0xb2   : > { %554 = vperm.xlu1 %745, %v190_v24   ;;  %490 = vrot.lane.b32.xlu0 %v488_v25, %s830_s6 }
  0xb6   : > { %528 = vrot.lane.b32.xlu1 %v526_v31, %s830_s6  ;;  %509 = vrot.lane.b32.xlu0 %v507_v30, %s830_s6 }
  0xba   : > { %547 = vrot.lane.b32.xlu0 %v545_v33, %s830_s6 }
 0x104   : > { %v328_v34 = vpop.permute.xlu1 %327  ;;  %v326_v35 = vpop.permute.xlu0 %325 }
 0x105   : > { %v330_v46 = vsel %vm329_vm2, %v326_v35, %v328_v34  ;;  %v334_v51 = vadd.f32 %v328_v34, %v313_v26 }
 0x106   : > { %v333_v49 = vadd.f32 %v330_v46, %v312_v27 }
 0x108   : > { %v349_v36 = vpop.permute.xlu1 %348  ;;  %v347_v37 = vpop.permute.xlu0 %346 }
 0x109   : > { %v350_v47 = vsel %vm329_vm2, %v347_v37, %v349_v36  ;;  %v354_v55 = vadd.f32 %v349_v36, %v334_v51 }
 0x10a   : > { %v353_v52 = vadd.f32 %v350_v47, %v333_v49 }
 0x10c   : > { %v369_v38 = vpop.permute.xlu1 %368  ;;  %v367_v39 = vpop.permute.xlu0 %366 }
 0x10d   : > { %v370_v50 = vsel %vm329_vm2, %v367_v39, %v369_v38  ;;  %v374_v59 = vadd.f32 %v369_v38, %v354_v55 }
 0x10e   : > { %v373_v56 = vadd.f32 %v370_v50, %v353_v52 }
 0x110   : > { %v389_v40 = vpop.permute.xlu1 %388  ;;  %v387_v41 = vpop.permute.xlu0 %386 }
 0x111   : > { %v390_v54 = vsel %vm329_vm2, %v387_v41, %v389_v40  ;;  %v394_v62 = vadd.f32 %v389_v40, %v374_v59 }
 0x112   : > { %v393_v60 = vadd.f32 %v390_v54, %v373_v56 }
 0x114   : > { %v407_v42 = vpop.permute.xlu0 %406  ;;  %v409_v43 = vpop.permute.xlu1 %408 }
 0x115   : > { %v411_v57 = vsel %vm410_vm3, %v407_v42, %v409_v43  ;;  %v415_v2 = vadd.f32 %v409_v43, %v394_v62 }
 0x116   : > { %v414_v63 = vadd.f32 %v411_v57, %v393_v60 }
 0x118   : > { %v428_v44 = vpop.permute.xlu0 %427  ;;  %v430_v45 = vpop.permute.xlu1 %429 }
 0x119   : > { %v431_v61 = vsel %vm410_vm3, %v428_v44, %v430_v45  ;;  %v435_v6 = vadd.f32 %v430_v45, %v415_v2 }
 0x11a   : > { %v434_v3 = vadd.f32 %v431_v61, %v414_v63 }
 0x11c   : > { %v448_v48 = vpop.permute.xlu0 %447  ;;  %v450_v53 = vpop.permute.xlu1 %449 }
 0x11d   : > { %v451_v1 = vsel %vm410_vm3, %v448_v48, %v450_v53  ;;  %v455_v8 = vadd.f32 %v450_v53, %v435_v6 }
 0x11e   : > { %v454_v7 = vadd.f32 %v451_v1, %v434_v3 }
 0x120   : > { %v468_v58 = vpop.permute.xlu0 %467  ;;  %v470_v0 = vpop.permute.xlu1 %469 }
 0x121   : > { %v471_v4 = vsel %vm410_vm3, %v468_v58, %v470_v0  ;;  %v475_v10 = vadd.f32 %v470_v0, %v455_v8 }
 0x122   : > { %v474_v9 = vadd.f32 %v471_v4, %v454_v7 }
 0x124   : > { %v491_v5 = vpop.permute.xlu0 %490 }
 0x125   : > { %v493_v13 = vadd.f32 %v491_v5, %v474_v9  ;;  %v494_v14 = vadd.f32 %v491_v5, %v475_v10 }
 0x128   : > { %v510_v11 = vpop.permute.xlu0 %509 }
 0x129   : > { %v512_v15 = vadd.f32 %v510_v11, %v493_v13  ;;  %v513_v16 = vadd.f32 %v510_v11, %v494_v14 }
 0x12c   : > { %v548_v20 = vpop.permute.xlu0 %547 }
 0x131   : > { %v555_v12 = vpop.permute.xlu1 %554 }
 0x135   : > { %v529_v17 = vpop.permute.xlu1 %528 }
 0x136   : > { %v531_v18 = vadd.f32 %v529_v17, %v512_v15  ;;  %v532_v19 = vadd.f32 %v529_v17, %v513_v16 }
 0x138   : > { %v550_v21 = vadd.f32 %v548_v20, %v531_v18  ;;  %v551_v22 = vadd.f32 %v548_v20, %v532_v19 }
 0x13a   : > { %v558_v23 = vadd.f32 %v555_v12, %v551_v22  ;;  %v557_v24 = vadd.f32 %v555_v12, %v550_v21 }
 0x13c   : > { %563 = vrot.lane.b32.xlu0 %v558_v23, %s831_s7  ;;  %561 = vrot.lane.b32.xlu1 %v557_v24, %s831_s7 }
 0x1ae   : > { %v564_v25 = vpop.permute.xlu0 %563  ;;  %v562_v26 = vpop.permute.xlu1 %561 }
 0x1af   : > { %v566_v27 = vsel %vm565_vm4, %v562_v26, %v564_v25 }
 0x1b0   : > { %569 = vst.msk [vmem:[%s175_s11] sm:$0xff] %vm568_vm5, %v566_v27 }
 0x1b1   : > { %759 = shalt.err (!%p756_p5)
}
 0x1b2   : > { %s760_s30 = scalar_lea.hbm %s981_s23, 128  ;;  %s764_s6 = scalar_lea.hbm %s1031_s3, 256 }
 0x1b3   : > { %p761_p6 = scmp.ne.s32.totalorder %s981_s23, %s760_s30  ;;  %p765_p10 = scmp.lt.u32.totalorder %s981_s23, %s1031_s3 }
 0x1b4   : > { %p766_p11 = scmp.lt.u32.totalorder %s764_s6, %s760_s30  ;;  %p768_p13 = scmp.lt.u32.totalorder %s760_s30, %s981_s23 }
 0x1b5   : > { %p762_p7 = pnand %p761_p6, %p893_p4 }
 0x1b6   : > { %p767_p12 = por %p766_p11, %p765_p10 }
 0x1b7   : > { %p763_p9 = pneg %p762_p7 }
 0x1b8   : > { %p769_p0 = por %p768_p13, %p767_p12 }
 0x1ba   : > { %p770_p1 = pnand %p769_p0, %p763_p9 }
 0x1bc   : > { %773 = shalt.err (!%p770_p1)
}
 0x1bd   : > { %683 = dma.vmem_to_hbm [thread:$0]  (%p893_p4), %s983_s18, 128, %s981_s23, %s571_s26  }
 0x1be PF: > { %p689_p2 = scmp.ge.s32.totalorder %s824_s17, 2  ;;  %s597_s9 = sand.u32 1, %s804_s12  }
 0x1bf   : > { %s598_s10 = scalar_lea.sflag [#allocation4], %s597_s9 }
 0x1c0   : > { %p686_p3 = pnand %p689_p2, %p900_p8 }
 0x1c2   : > { %799 = dma.done.wait (!%p686_p3), %s598_s10, 128  }
 0x1c3   : > { %801 = vsyncadd (!%p686_p3), %s598_s10, 4294967168  ;;  %s16_s17 = sadd.s32 1, %s824_s17   ;;  %s1034_s12 = smov %s808_s13 }
 0x1c4   : > { %p13_p5 = scmp.ge.s32.totalorder %s16_s17, 4   ;;  %s1035_s13 = smov %s812_s14 }
 0x1c5   : > { %s1036_s14 = smov %s906_s25  ;;  %s1037_s15 = smov %s820_s16 }
 0x1c6   : > { %s1038_s16 = smov %s1040_s20  ;;  %15 = sbr.rel (!%p13_p5) target bundleno = 4 (0x4), region = 86 }
 0x1cd   :  { %603 = vsyncpa [#allocation4], 1 }
 0x1ce   :  { %605 = vsyncpa [#allocation4 + $0x1], 1 }

</bundles_post_ra>
